<compile_context>
chip_gen: v6e
topology: v6e:2x2x1
jax: 0.10.0
libtpu: 0.0.40
codegen_flags: <defaults>
</compile_context>

<pallas_src>
import jax
import jax.numpy as jnp
from jax.experimental import pallas as pl
from jax.experimental.pallas import tpu as pltpu

_LANE = 128      # lane width (last dim)
_SUBLANE = 8     # f32 sublane count (second-to-last dim)


def _round_up(x, m):
    return (x + m - 1) // m * m


def _pad_to(a, axis, target):
    pad = target - a.shape[axis]
    if pad == 0:
        return a
    widths = [(0, 0)] * a.ndim
    widths[axis] = (0, pad)
    return jnp.pad(a, widths)


def _task_hypernet_kernel(x_ref, w1_ref, b1_ref, w2_ref, b2_ref, out_ref):
    """y = relu(x @ W1 + b1) @ W2 + b2 for one (tile_rows, D_in_pad) slab."""
    h = jnp.dot(x_ref[...], w1_ref[...], preferred_element_type=jnp.float32)
    h = jnp.maximum(h + b1_ref[...], 0.0)                 # bias + ReLU in f32
    y = jnp.dot(h.astype(w2_ref.dtype), w2_ref[...],
                preferred_element_type=jnp.float32)
    out_ref[...] = (y + b2_ref[...]).astype(out_ref.dtype)


def prepare_task_hypernet_params(w1, b1, w2, b2, weight_dtype=None):
    """One-time (offline) packing: pad all feature dims to 128-lane multiples.

    w1: (D_in, H)   b1: (H,)   w2: (H, D_out)   b2: (D_out,)
    (weights are the transpose of PyTorch's nn.Linear (out, in) layout).
    Optionally cast the weight matrices to `weight_dtype` (e.g. jnp.bfloat16)
    to halve weight DMA; biases stay f32 for the VPU epilogue.
    """
    d_in, hidden = w1.shape
    _, d_out = w2.shape
    d_in_p = _round_up(d_in, _LANE)
    hid_p = _round_up(hidden, _LANE)
    d_out_p = _round_up(d_out, _LANE)

    if weight_dtype is not None:
        w1 = w1.astype(weight_dtype)
        w2 = w2.astype(weight_dtype)

    w1p = _pad_to(_pad_to(w1, 0, d_in_p), 1, hid_p)
    b1p = _pad_to(b1.reshape(1, hidden).astype(jnp.float32), 1, hid_p)
    w2p = _pad_to(_pad_to(w2, 0, hid_p), 1, d_out_p)
    b2p = _pad_to(b2.reshape(1, d_out).astype(jnp.float32), 1, d_out_p)

    return dict(w1=w1p, b1=b1p, w2=w2p, b2=b2p,
                d_in=d_in, d_out=d_out, d_in_p=d_in_p, d_out_p=d_out_p)


def task_hypernet_forward_batched(task_embeddings, params, *,
                                  block_rows=128, out_dtype=jnp.float32):
    """Run the hypernet MLP on a batch of flattened task embeddings.

    task_embeddings: (B, D_in)  -> returns (B, D_out).
    """
    w1, b1, w2, b2 = params["w1"], params["b1"], params["w2"], params["b2"]
    d_in, d_out = params["d_in"], params["d_out"]
    d_in_p, d_out_p = params["d_in_p"], params["d_out_p"]
    hid_p = w1.shape[1]

    b = task_embeddings.shape[0]
    x = task_embeddings.reshape(b, -1)
    assert x.shape[1] == d_in, "task embedding size mismatch"
    if x.dtype != w1.dtype:
        x = x.astype(w1.dtype)          # match MXU input dtype (no forced f32)
    x = _pad_to(x, 1, d_in_p)

    if b <= block_rows:
        # Small batch: one block, no grid, no software-pipeline scaffolding.
        b_p = _round_up(b, _SUBLANE)
        x = _pad_to(x, 0, b_p)
        vmem = pl.BlockSpec(memory_space=pltpu.MemorySpace.VMEM)
        out = pl.pallas_call(
            _task_hypernet_kernel,
            out_shape=jax.ShapeDtypeStruct((b_p, d_out_p), out_dtype),
            in_specs=[vmem, vmem, vmem, vmem, vmem],
            out_specs=vmem,
        )(x, w1, b1, w2, b2)
    else:
        # Large batch: grid only over real batch tiles; weights stay resident.
        b_p = _round_up(b, block_rows)
        x = _pad_to(x, 0, b_p)
        n_tiles = b_p // block_rows
        out = pl.pallas_call(
            _task_hypernet_kernel,
            out_shape=jax.ShapeDtypeStruct((b_p, d_out_p), out_dtype),
            grid=(n_tiles,),
            in_specs=[
                pl.BlockSpec((block_rows, d_in_p), lambda i: (i, 0)),
                pl.BlockSpec((d_in_p, hid_p), lambda i: (0, 0)),
                pl.BlockSpec((1, hid_p), lambda i: (0, 0)),
                pl.BlockSpec((hid_p, d_out_p), lambda i: (0, 0)),
                pl.BlockSpec((1, d_out_p), lambda i: (0, 0)),
            ],
            out_specs=pl.BlockSpec((block_rows, d_out_p), lambda i: (i, 0)),
            compiler_params=pltpu.CompilerParams(
                dimension_semantics=("parallel",)),
        )(x, w1, b1, w2, b2)

    return out[:b, :d_out]


def task_hypernet_forward(task_embedding, params, out_dtype=jnp.float32):
    """Module-faithful forward: flatten, MLP, flatten -> (D_out,)."""
    x = task_embedding.reshape(1, -1)           # .view(-1) as a single row
    out = task_hypernet_forward_batched(x, params, out_dtype=out_dtype)
    return out.reshape(-1)                      # .view(-1)


def init_task_hypernet_params(key, task_embedding_dim, task_hidden_dim,
                              projected_task_embedding_dim, std=0.01):
    """Mirrors init_linear_layer: normal(std=0.01) weights, zero biases."""
    k1, k2 = jax.random.split(key)
    # PyTorch Linear weight is (out, in); we store the transpose (in, out).
    w1 = (jax.random.normal(k1, (task_hidden_dim, task_embedding_dim),
                            dtype=jnp.float32) * std).T
    b1 = jnp.zeros((task_hidden_dim,), dtype=jnp.float32)
    w2 = (jax.random.normal(k2, (projected_task_embedding_dim, task_hidden_dim),
                            dtype=jnp.float32) * std).T
    b2 = jnp.zeros((projected_task_embedding_dim,), dtype=jnp.float32)
    return w1, b1, w2, b2


if __name__ == "__main__":
    task_embedding_dim = 64
    task_hidden_dim = 128
    projected_task_embedding_dim = 64

    key = jax.random.PRNGKey(0)
    k_params, k_single, k_batch = jax.random.split(key, 3)

    w1, b1, w2, b2 = init_task_hypernet_params(
        k_params, task_embedding_dim, task_hidden_dim,
        projected_task_embedding_dim)
    params = prepare_task_hypernet_params(w1, b1, w2, b2)  # f32, module-exact

    # --- single task embedding (module semantics: .view(-1)) -----------------
    task_embedding = jax.random.normal(k_single, (8, 8), dtype=jnp.float32)
    out = jax.block_until_ready(task_hypernet_forward(task_embedding, params))
    x_flat = task_embedding.reshape(-1)
    ref = jnp.maximum(x_flat @ w1 + b1, 0.0) @ w2 + b2
    assert out.shape == (projected_task_embedding_dim,)
    assert jnp.allclose(out, ref, atol=1e-5, rtol=1e-4)

    # --- batched path: many embeddings in one pallas_call (gridded) ----------
    B = 300
    xb = jax.random.normal(k_batch, (B, task_embedding_dim), dtype=jnp.float32)
    outb = jax.block_until_ready(task_hypernet_forward_batched(xb, params))
    refb = jnp.maximum(xb @ w1 + b1, 0.0) @ w2 + b2
    assert outb.shape == (B, projected_task_embedding_dim)
    assert jnp.allclose(outb, refb, atol=1e-5, rtol=1e-4)

    print("KERNEL_OK")
</pallas_src>

<mosaic_0001>
module attributes {stable_mosaic.version = 11 : i64} {
  func.func @_task_hypernet_kernel(%arg0: memref<8x128xf32, #tpu.memory_space<vmem>>, %arg1: memref<128x128xf32, #tpu.memory_space<vmem>>, %arg2: memref<1x128xf32, #tpu.memory_space<vmem>>, %arg3: memref<128x128xf32, #tpu.memory_space<vmem>>, %arg4: memref<1x128xf32, #tpu.memory_space<vmem>>, %arg5: memref<8x128xf32, #tpu.memory_space<vmem>>) attributes {dimension_semantics = [], scalar_prefetch = 0 : i64, scratch_operands = 0 : i64, tpu.core_type = #tpu.core_type<tc>} {
    %c0 = arith.constant 0 : index
    %c0_0 = arith.constant 0 : index
    %0 = vector.load %arg0[%c0, %c0_0] : memref<8x128xf32, #tpu.memory_space<vmem>>, vector<8x128xf32>
    %c0_1 = arith.constant 0 : index
    %c0_2 = arith.constant 0 : index
    %1 = vector.load %arg1[%c0_1, %c0_2] : memref<128x128xf32, #tpu.memory_space<vmem>>, vector<128x128xf32>
    %cst = arith.constant dense<0.000000e+00> : vector<8x128xf32>
    %2 = tpu.matmul %0, %1, %cst {dimension_numbers = #tpu.dot_dimension_numbers<[1], [0], [0], [1], [0, 0, 1, 1], [], []>} : vector<8x128xf32>, vector<128x128xf32>, vector<8x128xf32> -> vector<8x128xf32>
    %c0_3 = arith.constant 0 : index
    %c0_4 = arith.constant 0 : index
    %3 = vector.load %arg2[%c0_3, %c0_4] : memref<1x128xf32, #tpu.memory_space<vmem>>, vector<1x128xf32>
    %4 = vector.broadcast %3 : vector<1x128xf32> to vector<8x128xf32>
    %5 = arith.addf %2, %4 : vector<8x128xf32>
    %cst_5 = arith.constant 0.000000e+00 : f32
    %6 = vector.broadcast %cst_5 : f32 to vector<8x128xf32>
    %7 = arith.maximumf %5, %6 : vector<8x128xf32>
    %c0_6 = arith.constant 0 : index
    %c0_7 = arith.constant 0 : index
    %8 = vector.load %arg3[%c0_6, %c0_7] : memref<128x128xf32, #tpu.memory_space<vmem>>, vector<128x128xf32>
    %cst_8 = arith.constant dense<0.000000e+00> : vector<8x128xf32>
    %9 = tpu.matmul %7, %8, %cst_8 {dimension_numbers = #tpu.dot_dimension_numbers<[1], [0], [0], [1], [0, 0, 1, 1], [], []>} : vector<8x128xf32>, vector<128x128xf32>, vector<8x128xf32> -> vector<8x128xf32>
    %c0_9 = arith.constant 0 : index
    %c0_10 = arith.constant 0 : index
    %10 = vector.load %arg4[%c0_9, %c0_10] : memref<1x128xf32, #tpu.memory_space<vmem>>, vector<1x128xf32>
    %11 = vector.broadcast %10 : vector<1x128xf32> to vector<8x128xf32>
    %12 = arith.addf %9, %11 : vector<8x128xf32>
    %c0_11 = arith.constant 0 : index
    %c0_12 = arith.constant 0 : index
    %13 = vector.load %arg5[%c0_11, %c0_12] : memref<8x128xf32, #tpu.memory_space<vmem>>, vector<8x128xf32>
    tpu.vector_store %arg5[%c0_11, %c0_12], %12 {strides = array<i32>} : memref<8x128xf32, #tpu.memory_space<vmem>>, vector<8x128xf32>,
    return
  }
}

</mosaic_0001>

<bundles_post_ra>
// kernel: tpu_custom_call.1
= control target key start
LH: loop header
LB: loop body
LE: loop exit
PB: predicated region body
PF: predicated region fallthrough
CT: control target
= control target key end

     0   :  { %10 = vsyncpa [#allocation3], 0  ;;  %s555_s0 = inlined_call_operand.hbm [shape: f32[8,128], index: 0, kind: input, shape index: {}]   ;;  %s556_s1 = inlined_call_operand.hbm [shape: f32[128,128], index: 1, kind: input, shape index: {}]   ;;  %s557_s2 = inlined_call_operand.vmem [shape: f32[1,128], index: 2, kind: input, shape index: {}]   ;;  %s558_s3 = inlined_call_operand.hbm [shape: f32[128,128], index: 3, kind: input, shape index: {}]   ;;  %s559_s4 = inlined_call_operand.vmem [shape: f32[1,128], index: 4, kind: input, shape index: {}]   ;;  %s560_s5 = inlined_call_operand.hbm [shape: f32[8,128], index: 5, kind: output, shape index: {}]  }
   0x1   :  { %11 = vsyncpa [#allocation6], 0 }
   0x2   :  { %12 = vsyncpa [#allocation4], 0  ;;  %s465_s18 = smov [#allocation5]  }
   0x3   :  { %s28_s19 = sshll.u32 %s465_s18, 4  ;;  %s29_s19 = int_to_ptr.vmem [resolvable:$true] %s28_s19 }
   0x4   :  { %s387_s20 = scalar_lea.vmem %s29_s19, 2048  ;;  %p392_p1 = scmp.lt.s32.totalorder %s29_s19, %s29_s19 }
   0x5   :  { %p388_p0 = scmp.ne.s32.totalorder %s29_s19, %s387_s20  ;;  %p393_p2 = scmp.lt.s32.totalorder %s387_s20, %s387_s20 }
   0x7   :  { %p394_p3 = por %p393_p2, %p392_p1 }
   0x9   :  { %p395_p4 = pnand %p394_p3, %p388_p0 }
   0xb   :  { %398 = shalt.err (!%p395_p4)
}
   0xc   :  { %s466_s21 = smov 128   ;;  %s467_s22 = smov 8  }
   0xd   :  { %34 = dma.hbm_to_vmem [thread:$0]  %s556_s1, 2048, %s29_s19, [#allocation6], %s466_s21, %s466_s21, %s467_s22  }
   0xe   :  { %s468_s25 = smov [#allocation2]   ;;  %s469_s27 = smov [#allocation7]  }
   0xf   :  { %s19_s26 = sshll.u32 %s468_s25, 4  ;;  %s42_s28 = sshll.u32 %s469_s27, 4  ;;  %s20_s26 = int_to_ptr.vmem [resolvable:$true] %s19_s26  ;;  %s43_s28 = int_to_ptr.vmem [resolvable:$true] %s42_s28 }
  0x10   :  { %s407_s29 = scalar_lea.vmem %s20_s26, 128  ;;  %p412_p6 = scmp.lt.s32.totalorder %s20_s26, %s20_s26 }
  0x11   :  { %p408_p5 = scmp.ne.s32.totalorder %s20_s26, %s407_s29  ;;  %p413_p7 = scmp.lt.s32.totalorder %s407_s29, %s407_s29 }
  0x13   :  { %p414_p8 = por %p413_p7, %p412_p6 }
  0x15   :  { %p415_p9 = pnand %p414_p8, %p408_p5 }
  0x17   :  { %418 = shalt.err (!%p415_p9)
}
  0x18   :  { %22 = dma.hbm_to_vmem [thread:$0]  %s555_s0, 128, %s20_s26, [#allocation3]  }
  0x19   :  { %s427_s7 = scalar_lea.vmem %s43_s28, 2048  ;;  %p432_p11 = scmp.lt.s32.totalorder %s43_s28, %s43_s28 }
  0x1a   :  { %p428_p10 = scmp.ne.s32.totalorder %s43_s28, %s427_s7  ;;  %p433_p12 = scmp.lt.s32.totalorder %s427_s7, %s427_s7 }
  0x1c   :  { %p434_p13 = por %p433_p12, %p432_p11 }
  0x1e   :  { %p435_p0 = pnand %p434_p13, %p428_p10 }
  0x20   :  { %438 = shalt.err (!%p435_p0)
}
  0x21   :  { %48 = dma.hbm_to_vmem [thread:$0]  %s558_s3, 2048, %s43_s28, [#allocation6], %s466_s21, %s466_s21, %s467_s22  }
  0x22   :  { %459 = dma.done.wait [#allocation3], 128  }
  0x23   :  { %460 = vsyncadd [#allocation3], 4294967168 }
  0x24   :  { %461 = dma.done.wait [#allocation6], 4096  }
  0x25   :  { %462 = vsyncadd [#allocation6], 4294963200  ;;  %v470_v0 = vmov 0.0   ;;  %vm471_vm0 = vmmov 0   ;;  %v76_v1 = vld [vmem:[#allocation5 + $0x78] sm:$0xff]  ;;  %v75_v2 = vld [vmem:[#allocation5 + $0x70] sm:$0xff] }
  0x26   :  { %301 = vmatprep.subr.mxu0 %v470_v0  ;;  %333 = vmatprep.mubr.msk.f32.mxu0 %vm471_vm0, %v470_v0  ;;  %v74_v3 = vld [vmem:[#allocation5 + $0x68] sm:$0xff]  ;;  %v73_v4 = vld [vmem:[#allocation5 + $0x60] sm:$0xff]  ;;  %v170_v5 = vld [vmem:[#allocation7 + $0x78] sm:$0xff]  ;;  %s472_s11 = smov [#allocation8]  }
  0x27   :  { %336 = vmatprep.subr.mxu1 %v470_v0  ;;  %368 = vmatprep.mubr.msk.f32.mxu1 %vm471_vm0, %v470_v0  ;;  %v72_v6 = vld [vmem:[#allocation5 + $0x58] sm:$0xff]  ;;  %v169_v7 = vld [vmem:[#allocation7 + $0x70] sm:$0xff]  ;;  %v168_v8 = vld [vmem:[#allocation7 + $0x68] sm:$0xff]  ;;  %s255_s12 = sshll.u32 %s472_s11, 4  ;;  %s256_s12 = int_to_ptr.vmem [resolvable:$true] %s255_s12 }
  0x28   :  { %302 = vmatpush3.msra.mxu0 %v76_v1  ;;  %337 = vmatpush3.msra.mxu1 %v170_v5  ;;  %v71_v9 = vld [vmem:[#allocation5 + $0x50] sm:$0xff]  ;;  %v167_v10 = vld [vmem:[#allocation7 + $0x60] sm:$0xff]  ;;  %v70_v11 = vld [vmem:[#allocation5 + $0x48] sm:$0xff]  ;;  %s439_s13 = scalar_lea.vmem %s256_s12, 128  ;;  %p444_p2 = scmp.lt.s32.totalorder %s256_s12, %s256_s12 }
  0x29   :  { %303 = vmatprep.subr.mxu0 %v470_v0  ;;  %338 = vmatprep.subr.mxu1 %v470_v0  ;;  %v166_v12 = vld [vmem:[#allocation7 + $0x58] sm:$0xff]  ;;  %v69_v13 = vld [vmem:[#allocation5 + $0x40] sm:$0xff]  ;;  %v165_v14 = vld [vmem:[#allocation7 + $0x50] sm:$0xff]  ;;  %p440_p1 = scmp.ne.s32.totalorder %s256_s12, %s439_s13  ;;  %p445_p3 = scmp.lt.s32.totalorder %s439_s13, %s439_s13 }
  0x2a   :  { %304 = vmatpush3.msra.mxu0 %v75_v2  ;;  %339 = vmatpush3.msra.mxu1 %v169_v7  ;;  %v68_v15 = vld [vmem:[#allocation5 + $0x38] sm:$0xff]  ;;  %v164_v16 = vld [vmem:[#allocation7 + $0x48] sm:$0xff]  ;;  %v67_v17 = vld [vmem:[#allocation5 + $0x30] sm:$0xff] }
  0x2b   :  { %305 = vmatprep.subr.mxu0 %v470_v0  ;;  %340 = vmatprep.subr.mxu1 %v470_v0  ;;  %v163_v18 = vld [vmem:[#allocation7 + $0x40] sm:$0xff]  ;;  %v66_v19 = vld [vmem:[#allocation5 + $0x28] sm:$0xff]  ;;  %v162_v20 = vld [vmem:[#allocation7 + $0x38] sm:$0xff]  ;;  %p446_p4 = por %p445_p3, %p444_p2 }
  0x2c   :  { %306 = vmatpush3.msra.mxu0 %v74_v3  ;;  %341 = vmatpush3.msra.mxu1 %v168_v8  ;;  %v65_v21 = vld [vmem:[#allocation5 + $0x20] sm:$0xff]  ;;  %v161_v22 = vld [vmem:[#allocation7 + $0x30] sm:$0xff]  ;;  %v64_v23 = vld [vmem:[#allocation5 + $0x18] sm:$0xff] }
  0x2d   :  { %307 = vmatprep.subr.mxu0 %v470_v0  ;;  %342 = vmatprep.subr.mxu1 %v470_v0  ;;  %v160_v24 = vld [vmem:[#allocation7 + $0x28] sm:$0xff]  ;;  %v63_v25 = vld [vmem:[#allocation5 + $0x10] sm:$0xff]  ;;  %v159_v26 = vld [vmem:[#allocation7 + $0x20] sm:$0xff]  ;;  %p447_p5 = pnand %p446_p4, %p440_p1 }
  0x2e   :  { %308 = vmatpush3.msra.mxu0 %v73_v4  ;;  %343 = vmatpush3.msra.mxu1 %v167_v10  ;;  %v62_v27 = vld [vmem:[#allocation5 + $0x8] sm:$0xff]  ;;  %v158_v28 = vld [vmem:[#allocation7 + $0x18] sm:$0xff]  ;;  %v61_v29 = vld [vmem:[#allocation5] sm:$0xff] }
  0x2f   :  { %309 = vmatprep.subr.mxu0 %v470_v0  ;;  %344 = vmatprep.subr.mxu1 %v470_v0  ;;  %v60_v30 = vld [vmem:[#allocation2] sm:$0xff]  ;;  %v157_v31 = vld [vmem:[#allocation7 + $0x10] sm:$0xff]  ;;  %v156_v32 = vld [vmem:[#allocation7 + $0x8] sm:$0xff] }
  0x30   :  { %310 = vmatpush3.msra.mxu0 %v72_v6  ;;  %345 = vmatpush3.msra.mxu1 %v166_v12  ;;  %v155_v33 = vld [vmem:[#allocation7] sm:$0xff]  ;;  %v265_v34 = vld [vmem:[%s557_s2] ss:$0 sm:$0xff] }
  0x31   :  { %311 = vmatprep.subr.mxu0 %v470_v0  ;;  %346 = vmatprep.subr.mxu1 %v470_v0  ;;  %v266_v39 = vld [vmem:[%s559_s4] ss:$0 sm:$0xff] }
  0x32   :  { %312 = vmatpush3.msra.mxu0 %v71_v9  ;;  %347 = vmatpush3.msra.mxu1 %v165_v14 }
  0x33   :  { %313 = vmatprep.subr.mxu0 %v470_v0  ;;  %348 = vmatprep.subr.mxu1 %v470_v0 }
  0x34   :  { %314 = vmatpush3.msra.mxu0 %v70_v11  ;;  %349 = vmatpush3.msra.mxu1 %v164_v16 }
  0x35   :  { %315 = vmatprep.subr.mxu0 %v470_v0  ;;  %350 = vmatprep.subr.mxu1 %v470_v0 }
  0x36   :  { %316 = vmatpush3.msra.mxu0 %v69_v13  ;;  %351 = vmatpush3.msra.mxu1 %v163_v18 }
  0x37   :  { %317 = vmatprep.subr.mxu0 %v470_v0  ;;  %352 = vmatprep.subr.mxu1 %v470_v0 }
  0x38   :  { %318 = vmatpush3.msra.mxu0 %v68_v15  ;;  %353 = vmatpush3.msra.mxu1 %v162_v20 }
  0x39   :  { %319 = vmatprep.subr.mxu0 %v470_v0  ;;  %354 = vmatprep.subr.mxu1 %v470_v0 }
  0x3a   :  { %320 = vmatpush3.msra.mxu0 %v67_v17  ;;  %355 = vmatpush3.msra.mxu1 %v161_v22 }
  0x3b   :  { %321 = vmatprep.subr.mxu0 %v470_v0  ;;  %356 = vmatprep.subr.mxu1 %v470_v0 }
  0x3c   :  { %322 = vmatpush3.msra.mxu0 %v66_v19  ;;  %357 = vmatpush3.msra.mxu1 %v160_v24 }
  0x3d   :  { %323 = vmatprep.subr.mxu0 %v470_v0  ;;  %358 = vmatprep.subr.mxu1 %v470_v0 }
  0x3e   :  { %324 = vmatpush3.msra.mxu0 %v65_v21  ;;  %359 = vmatpush3.msra.mxu1 %v159_v26 }
  0x3f   :  { %325 = vmatprep.subr.mxu0 %v470_v0  ;;  %360 = vmatprep.subr.mxu1 %v470_v0 }
  0x40   :  { %326 = vmatpush3.msra.mxu0 %v64_v23  ;;  %361 = vmatpush3.msra.mxu1 %v158_v28 }
  0x41   :  { %327 = vmatprep.subr.mxu0 %v470_v0  ;;  %362 = vmatprep.subr.mxu1 %v470_v0 }
  0x42   :  { %328 = vmatpush3.msra.mxu0 %v63_v25  ;;  %363 = vmatpush3.msra.mxu1 %v157_v31 }
  0x43   :  { %329 = vmatprep.subr.mxu0 %v470_v0  ;;  %364 = vmatprep.subr.mxu1 %v470_v0 }
  0x44   :  { %330 = vmatpush3.msra.mxu0 %v62_v27  ;;  %365 = vmatpush3.msra.mxu1 %v156_v32 }
  0x45   :  { %331 = vmatprep.subr.mxu0 %v470_v0  ;;  %366 = vmatprep.subr.mxu1 %v470_v0 }
  0x46   :  { %332 = vmatpush3.msra.mxu0 %v61_v29  ;;  %367 = vmatpush3.msra.mxu1 %v155_v33 }
  0x47   :  { %334 = vmatmul.mubr.f32.vlgmr.msra.gmra.mxu0 %v60_v30 }
 0x107   :  { %v150_v35 = vpop.f32.mrf.mxu0 }
 0x108   :  { %v151_v36 = vadd.f32 %v265_v34, %v150_v35 }
 0x109   :  { %v335_v37 = vpop.f32.mrf.mxu0 }
 0x10a   :  { %v154_v38 = vmax.f32 %v151_v36, 0.0 }
 0x10c   :  { %369 = vmatmul.mubr.f32.vlgmr.msra.gmra.mxu1 %v154_v38 }
 0x1cc   :  { %v244_v40 = vpop.f32.mrf.mxu1 }
 0x1cd   :  { %v245_v41 = vadd.f32 %v266_v39, %v244_v40 }
 0x1ce   :  { %v370_v42 = vpop.f32.mrf.mxu1 }
 0x1cf   :  { %248 = vst [vmem:[#allocation8] sm:$0xff] %v245_v41 }
 0x1d0   :  { %450 = shalt.err (!%p447_p5)
}
 0x1d1   :  { %258 = dma.vmem_to_hbm [thread:$0]  %s256_s12, 128, %s560_s5, [#allocation4]  }
 0x1d2   :  { %463 = dma.done.wait [#allocation4], 128  }
 0x1d3   :  { %464 = vsyncadd [#allocation4], 4294967168 }
 0x1d4   :  { %262 = vsyncpa [#allocation3], 1 }
 0x1d5   :  { %263 = vsyncpa [#allocation6], 1 }
 0x1d6   :  { %264 = vsyncpa [#allocation4], 1 }

</bundles_post_ra>
